<compile_context>
chip_gen: v6e
topology: v6e:2x2x1
jax: 0.10.0
libtpu: 0.0.40
codegen_flags: <defaults>
</compile_context>

<pallas_src>
import jax
import jax.numpy as jnp
from jax.experimental import pallas as pl
from jax.experimental.pallas import tpu as pltpu


def _round_up(x, m):
    return ((x + m - 1) // m) * m


def agent_kernel(x_ref,
                 win_ref, bin_ref,
                 wmid_ref, bmid_ref,
                 wout_ref, bout_ref,
                 out_ref):
    x = x_ref[...]
    # Layer 1 (fused fc_1 | fc_agg) + ReLU
    y = jnp.dot(x, win_ref[...], preferred_element_type=jnp.float32) + bin_ref[...]
    y = jnp.maximum(y, 0.0)
    # Layer 2 (fc_2 on the first half, exact identity pass-through on the second) + ReLU
    z = jnp.dot(y, wmid_ref[...], preferred_element_type=jnp.float32) + bmid_ref[...]
    z = jnp.maximum(z, 0.0)
    # Layer 3 (block-diagonal fc_3 | fc_agg_2, zero-padded to a lane-dense slab)
    out_ref[...] = jnp.dot(z, wout_ref[...],
                           preferred_element_type=jnp.float32) + bout_ref[...]


def build_fused_params(p):
    """Fuse the two-branch weights into 3 matmul operands (pure JAX, one-time)."""
    S, H = p["w1"].shape
    d3 = p["w3"].shape[1]
    dA = p["wa2"].shape[1]
    out_pad = _round_up(d3 + dA, 128)

    w_in = jnp.concatenate([p["w1"], p["wa"]], axis=1)              # (S, 2H)
    b_in = jnp.concatenate([p["b1"], p["ba"]], axis=1)              # (1, 2H)

    w_mid = jnp.zeros((2 * H, 2 * H), jnp.float32)
    w_mid = w_mid.at[:H, :H].set(p["w2"])
    w_mid = w_mid.at[H:, H:].set(jnp.eye(H, dtype=jnp.float32))     # identity pass-through
    b_mid = jnp.concatenate([p["b2"], jnp.zeros((1, H), jnp.float32)], axis=1)

    w_out = jnp.zeros((2 * H, out_pad), jnp.float32)
    w_out = w_out.at[:H, :d3].set(p["w3"])
    w_out = w_out.at[H:, d3:d3 + dA].set(p["wa2"])
    b_out = jnp.zeros((1, out_pad), jnp.float32)
    b_out = b_out.at[:, :d3].set(p["b3"])
    b_out = b_out.at[:, d3:d3 + dA].set(p["ba2"])

    return dict(w_in=w_in, b_in=b_in, w_mid=w_mid, b_mid=b_mid,
                w_out=w_out, b_out=b_out, d3=d3, dA=dA)


def agent_forward(x, params, *, max_tile_b=512):
    """x: (B, state_size) float32.  params: dict of (in,out) weights / (1,out) biases."""
    B, S = x.shape
    f = build_fused_params(params)
    d3, dA = f["d3"], f["dA"]
    H2 = f["w_mid"].shape[0]
    out_pad = f["w_out"].shape[1]

    # Batch tiling: large tiles for bandwidth/pipelining, rows padded to a sublane multiple.
    tile_b = min(max_tile_b, _round_up(B, 8))
    b_pad = _round_up(B, tile_b)
    if b_pad != B:
        x = jnp.pad(x, ((0, b_pad - B), (0, 0)))
    grid = (pl.cdiv(b_pad, tile_b),)

    def resident(shape):
        # Weights/biases: same block every grid step -> stays VMEM-resident.
        return pl.BlockSpec(shape, lambda i: (0, 0))

    out = pl.pallas_call(
        agent_kernel,
        out_shape=jax.ShapeDtypeStruct((b_pad, out_pad), jnp.float32),
        grid=grid,
        in_specs=[
            pl.BlockSpec((tile_b, S), lambda i: (i, 0)),   # x: tiled over batch
            resident((S, H2)), resident((1, H2)),          # fused layer-1 weight/bias
            resident((H2, H2)), resident((1, H2)),         # fused layer-2 weight/bias
            resident((H2, out_pad)), resident((1, out_pad)),  # fused layer-3 weight/bias
        ],
        out_specs=pl.BlockSpec((tile_b, out_pad), lambda i: (i, 0)),
        compiler_params=pltpu.CompilerParams(
            dimension_semantics=("parallel",)),            # megacore split on v7x
    )(x, f["w_in"], f["b_in"], f["w_mid"], f["b_mid"], f["w_out"], f["b_out"])

    return out[:B, :d3], out[:B, d3:d3 + dA]


def init_params(key, state_size, hidden_size, num_groups_per_step, num_attr, num_agg):
    """Deterministic synthetic parameters (PyTorch Linear shapes, stored transposed)."""
    ks = jax.random.split(key, 10)

    def lin(kw, kb, fan_in, fan_out):
        bound = 1.0 / jnp.sqrt(fan_in)
        w = jax.random.uniform(kw, (fan_in, fan_out), jnp.float32, -bound, bound)
        b = jax.random.uniform(kb, (1, fan_out), jnp.float32, -bound, bound)
        return w, b

    w1, b1 = lin(ks[0], ks[1], state_size, hidden_size)
    w2, b2 = lin(ks[2], ks[3], hidden_size, hidden_size)
    w3, b3 = lin(ks[4], ks[5], hidden_size, num_groups_per_step * num_attr)
    wa, ba = lin(ks[6], ks[7], state_size, hidden_size)
    wa2, ba2 = lin(ks[8], ks[9], hidden_size, num_agg)
    return dict(w1=w1, b1=b1, w2=w2, b2=b2, w3=w3, b3=b3,
                wa=wa, ba=ba, wa2=wa2, ba2=ba2)


def agent_reference(x, p):
    """Pure-JAX reference matching the PyTorch forward (f32)."""
    h1 = jnp.maximum(x @ p["w1"] + p["b1"], 0.0)
    h2 = jnp.maximum(h1 @ p["w2"] + p["b2"], 0.0)
    out3 = h2 @ p["w3"] + p["b3"]
    ha = jnp.maximum(x @ p["wa"] + p["ba"], 0.0)
    out_agg = ha @ p["wa2"] + p["ba2"]
    return out3, out_agg


if __name__ == "__main__":
    # Small shapes consistent with the module's forward.
    B = 8
    state_size = 32
    hidden_size = 32
    num_groups_per_step = 4
    num_attr = 4
    num_agg = 8

    key = jax.random.PRNGKey(0)
    k_x, k_p = jax.random.split(key)
    x = jax.random.normal(k_x, (B, state_size), dtype=jnp.float32)
    params = init_params(k_p, state_size, hidden_size,
                         num_groups_per_step, num_attr, num_agg)

    out3, out_agg = agent_forward(x, params)
    out3, out_agg = jax.block_until_ready((out3, out_agg))

    ref3, ref_agg = agent_reference(x, params)
    assert out3.shape == (B, num_groups_per_step * num_attr)
    assert out_agg.shape == (B, num_agg)
    assert jnp.allclose(out3, ref3, atol=2e-5, rtol=1e-4)
    assert jnp.allclose(out_agg, ref_agg, atol=2e-5, rtol=1e-4)

    print("KERNEL_OK")
</pallas_src>

<mosaic_0001>
module attributes {stable_mosaic.version = 11 : i64} {
  func.func @agent_kernel(%arg0: i32, %arg1: memref<8x32xf32, #tpu.memory_space<vmem>>, %arg2: memref<32x64xf32, #tpu.memory_space<vmem>>, %arg3: memref<1x64xf32, #tpu.memory_space<vmem>>, %arg4: memref<64x64xf32, #tpu.memory_space<vmem>>, %arg5: memref<1x64xf32, #tpu.memory_space<vmem>>, %arg6: memref<64x128xf32, #tpu.memory_space<vmem>>, %arg7: memref<1x128xf32, #tpu.memory_space<vmem>>, %arg8: memref<8x128xf32, #tpu.memory_space<vmem>>) attributes {dimension_semantics = [#tpu.dimension_semantics<parallel>], iteration_bounds = array<i64: 1>, scalar_prefetch = 0 : i64, scratch_operands = 0 : i64, tpu.core_type = #tpu.core_type<tc>, window_params = [{transform_indices = @transform_0, window_bounds = array<i64: 8, 32>}, {pipeline_mode = #tpu.pipeline_mode<synchronous>, transform_indices = @transform_1, window_bounds = array<i64: 32, 64>}, {pipeline_mode = #tpu.pipeline_mode<synchronous>, transform_indices = @transform_2, window_bounds = array<i64: 1, 64>}, {pipeline_mode = #tpu.pipeline_mode<synchronous>, transform_indices = @transform_3, window_bounds = array<i64: 64, 64>}, {pipeline_mode = #tpu.pipeline_mode<synchronous>, transform_indices = @transform_4, window_bounds = array<i64: 1, 64>}, {pipeline_mode = #tpu.pipeline_mode<synchronous>, transform_indices = @transform_5, window_bounds = array<i64: 64, 128>}, {pipeline_mode = #tpu.pipeline_mode<synchronous>, transform_indices = @transform_6, window_bounds = array<i64: 1, 128>}, {transform_indices = @transform_7, window_bounds = array<i64: 8, 128>}]} {
    %c0 = arith.constant 0 : index
    %c0_0 = arith.constant 0 : index
    %0 = vector.load %arg1[%c0, %c0_0] : memref<8x32xf32, #tpu.memory_space<vmem>>, vector<8x32xf32>
    %c0_1 = arith.constant 0 : index
    %c0_2 = arith.constant 0 : index
    %1 = vector.load %arg2[%c0_1, %c0_2] : memref<32x64xf32, #tpu.memory_space<vmem>>, vector<32x64xf32>
    %cst = arith.constant dense<0.000000e+00> : vector<8x64xf32>
    %2 = tpu.matmul %0, %1, %cst {dimension_numbers = #tpu.dot_dimension_numbers<[1], [0], [0], [1], [0, 0, 1, 1], [], []>} : vector<8x32xf32>, vector<32x64xf32>, vector<8x64xf32> -> vector<8x64xf32>
    %c0_3 = arith.constant 0 : index
    %c0_4 = arith.constant 0 : index
    %3 = vector.load %arg3[%c0_3, %c0_4] : memref<1x64xf32, #tpu.memory_space<vmem>>, vector<1x64xf32>
    %4 = vector.broadcast %3 : vector<1x64xf32> to vector<8x64xf32>
    %5 = arith.addf %2, %4 : vector<8x64xf32>
    %cst_5 = arith.constant 0.000000e+00 : f32
    %6 = vector.broadcast %cst_5 : f32 to vector<8x64xf32>
    %7 = arith.maximumf %5, %6 : vector<8x64xf32>
    %c0_6 = arith.constant 0 : index
    %c0_7 = arith.constant 0 : index
    %8 = vector.load %arg4[%c0_6, %c0_7] : memref<64x64xf32, #tpu.memory_space<vmem>>, vector<64x64xf32>
    %cst_8 = arith.constant dense<0.000000e+00> : vector<8x64xf32>
    %9 = tpu.matmul %7, %8, %cst_8 {dimension_numbers = #tpu.dot_dimension_numbers<[1], [0], [0], [1], [0, 0, 1, 1], [], []>} : vector<8x64xf32>, vector<64x64xf32>, vector<8x64xf32> -> vector<8x64xf32>
    %c0_9 = arith.constant 0 : index
    %c0_10 = arith.constant 0 : index
    %10 = vector.load %arg5[%c0_9, %c0_10] : memref<1x64xf32, #tpu.memory_space<vmem>>, vector<1x64xf32>
    %11 = vector.broadcast %10 : vector<1x64xf32> to vector<8x64xf32>
    %12 = arith.addf %9, %11 : vector<8x64xf32>
    %cst_11 = arith.constant 0.000000e+00 : f32
    %13 = vector.broadcast %cst_11 : f32 to vector<8x64xf32>
    %14 = arith.maximumf %12, %13 : vector<8x64xf32>
    %c0_12 = arith.constant 0 : index
    %c0_13 = arith.constant 0 : index
    %15 = vector.load %arg6[%c0_12, %c0_13] : memref<64x128xf32, #tpu.memory_space<vmem>>, vector<64x128xf32>
    %cst_14 = arith.constant dense<0.000000e+00> : vector<8x128xf32>
    %16 = tpu.matmul %14, %15, %cst_14 {dimension_numbers = #tpu.dot_dimension_numbers<[1], [0], [0], [1], [0, 0, 1, 1], [], []>} : vector<8x64xf32>, vector<64x128xf32>, vector<8x128xf32> -> vector<8x128xf32>
    %c0_15 = arith.constant 0 : index
    %c0_16 = arith.constant 0 : index
    %17 = vector.load %arg7[%c0_15, %c0_16] : memref<1x128xf32, #tpu.memory_space<vmem>>, vector<1x128xf32>
    %18 = vector.broadcast %17 : vector<1x128xf32> to vector<8x128xf32>
    %19 = arith.addf %16, %18 : vector<8x128xf32>
    %c0_17 = arith.constant 0 : index
    %c0_18 = arith.constant 0 : index
    %20 = vector.load %arg8[%c0_17, %c0_18] : memref<8x128xf32, #tpu.memory_space<vmem>>, vector<8x128xf32>
    tpu.vector_store %arg8[%c0_17, %c0_18], %19 {strides = array<i32>} : memref<8x128xf32, #tpu.memory_space<vmem>>, vector<8x128xf32>,
    return
  }
  func.func @transform_0(%arg0: i32) -> (i32, i32) {
    %c0_i32 = arith.constant 0 : i32
    %c0_i32_0 = arith.constant 0 : i32
    return %arg0, %c0_i32 : i32, i32
  }
  func.func @transform_1(%arg0: i32) -> (i32, i32) {
    %c0_i32 = arith.constant 0 : i32
    %c0_i32_0 = arith.constant 0 : i32
    %c0_i32_1 = arith.constant 0 : i32
    return %c0_i32, %c0_i32_0 : i32, i32
  }
  func.func @transform_2(%arg0: i32) -> (i32, i32) {
    %c0_i32 = arith.constant 0 : i32
    %c0_i32_0 = arith.constant 0 : i32
    %c0_i32_1 = arith.constant 0 : i32
    return %c0_i32, %c0_i32_0 : i32, i32
  }
  func.func @transform_3(%arg0: i32) -> (i32, i32) {
    %c0_i32 = arith.constant 0 : i32
    %c0_i32_0 = arith.constant 0 : i32
    %c0_i32_1 = arith.constant 0 : i32
    return %c0_i32, %c0_i32_0 : i32, i32
  }
  func.func @transform_4(%arg0: i32) -> (i32, i32) {
    %c0_i32 = arith.constant 0 : i32
    %c0_i32_0 = arith.constant 0 : i32
    %c0_i32_1 = arith.constant 0 : i32
    return %c0_i32, %c0_i32_0 : i32, i32
  }
  func.func @transform_5(%arg0: i32) -> (i32, i32) {
    %c0_i32 = arith.constant 0 : i32
    %c0_i32_0 = arith.constant 0 : i32
    %c0_i32_1 = arith.constant 0 : i32
    return %c0_i32, %c0_i32_0 : i32, i32
  }
  func.func @transform_6(%arg0: i32) -> (i32, i32) {
    %c0_i32 = arith.constant 0 : i32
    %c0_i32_0 = arith.constant 0 : i32
    %c0_i32_1 = arith.constant 0 : i32
    return %c0_i32, %c0_i32_0 : i32, i32
  }
  func.func @transform_7(%arg0: i32) -> (i32, i32) {
    %c0_i32 = arith.constant 0 : i32
    %c0_i32_0 = arith.constant 0 : i32
    return %arg0, %c0_i32 : i32, i32
  }
}

</mosaic_0001>

<bundles_post_ra>
// kernel: tpu_custom_call.1
= control target key start
LH: loop header
LB: loop body
LE: loop exit
PB: predicated region body
PF: predicated region fallthrough
CT: control target
= control target key end

     0   :  { %12 = vsyncpa [#allocation3], 0  ;;  %s668_s0 = inlined_call_operand.hbm [shape: f32[8,32], index: 0, kind: input, shape index: {}]   ;;  %s669_s1 = inlined_call_operand.hbm [shape: f32[32,64], index: 1, kind: input, shape index: {}]   ;;  %s670_s2 = inlined_call_operand.vmem [shape: f32[1,64], index: 2, kind: input, shape index: {}]   ;;  %s671_s3 = inlined_call_operand.hbm [shape: f32[64,64], index: 3, kind: input, shape index: {}]   ;;  %s672_s4 = inlined_call_operand.vmem [shape: f32[1,64], index: 4, kind: input, shape index: {}]   ;;  %s673_s5 = inlined_call_operand.hbm [shape: f32[64,128], index: 5, kind: input, shape index: {}]   ;;  %s674_s6 = inlined_call_operand.vmem [shape: f32[1,128], index: 6, kind: input, shape index: {}]   ;;  %s675_s7 = inlined_call_operand.hbm [shape: f32[8,128], index: 7, kind: output, shape index: {}]  }
   0x1   :  { %13 = vsyncpa [#allocation6], 0 }
   0x2   :  { %14 = vsyncpa [#allocation9], 0 }
   0x3   :  { %15 = vsyncpa [#allocation4], 0  ;;  %s558_s24 = smov [#allocation5]  }
   0x4   :  { %s31_s25 = sshll.u32 %s558_s24, 4  ;;  %s32_s25 = int_to_ptr.vmem [resolvable:$true] %s31_s25 }
   0x5   :  { %s458_s26 = scalar_lea.vmem %s32_s25, 512  ;;  %p463_p1 = scmp.lt.s32.totalorder %s32_s25, %s32_s25 }
   0x6   :  { %p459_p0 = scmp.ne.s32.totalorder %s32_s25, %s458_s26  ;;  %p464_p2 = scmp.lt.s32.totalorder %s458_s26, %s458_s26 }
   0x8   :  { %p465_p3 = por %p464_p2, %p463_p1 }
   0xa   :  { %p466_p4 = pnand %p465_p3, %p459_p0 }
   0xc   :  { %469 = shalt.err (!%p466_p4)
}
   0xd   :  { %s559_s27 = smov 128   ;;  %s560_s28 = smov 8  }
   0xe   :  { %37 = dma.hbm_to_vmem [thread:$0]  %s669_s1, 512, %s32_s25, [#allocation6], %s559_s27, %s559_s27, %s560_s28  }
   0xf   :  { %s561_s8 = smov [#allocation2]   ;;  %s562_s10 = smov [#allocation7]  }
  0x10   :  { %s22_s9 = sshll.u32 %s561_s8, 4  ;;  %s45_s11 = sshll.u32 %s562_s10, 4  ;;  %s23_s9 = int_to_ptr.vmem [resolvable:$true] %s22_s9  ;;  %s46_s11 = int_to_ptr.vmem [resolvable:$true] %s45_s11 }
  0x11   :  { %s478_s12 = scalar_lea.vmem %s23_s9, 128  ;;  %p483_p6 = scmp.lt.s32.totalorder %s23_s9, %s23_s9 }
  0x12   :  { %p479_p5 = scmp.ne.s32.totalorder %s23_s9, %s478_s12  ;;  %p484_p7 = scmp.lt.s32.totalorder %s478_s12, %s478_s12 }
  0x14   :  { %p485_p8 = por %p484_p7, %p483_p6 }
  0x16   :  { %p486_p9 = pnand %p485_p8, %p479_p5 }
  0x18   :  { %489 = shalt.err (!%p486_p9)
}
  0x19   :  { %25 = dma.hbm_to_vmem [thread:$0]  %s668_s0, 128, %s23_s9, [#allocation3]  }
  0x1a   :  { %s498_s15 = scalar_lea.vmem %s46_s11, 1024  ;;  %p503_p11 = scmp.lt.s32.totalorder %s46_s11, %s46_s11 }
  0x1b   :  { %p499_p10 = scmp.ne.s32.totalorder %s46_s11, %s498_s15  ;;  %p504_p12 = scmp.lt.s32.totalorder %s498_s15, %s498_s15 }
  0x1d   :  { %p505_p13 = por %p504_p12, %p503_p11 }
  0x1f   :  { %p506_p0 = pnand %p505_p13, %p499_p10 }
  0x21   :  { %509 = shalt.err (!%p506_p0)
}
  0x22   :  { %51 = dma.hbm_to_vmem [thread:$0]  %s671_s3, 1024, %s46_s11, [#allocation6], %s559_s27, %s559_s27, %s560_s28  }
  0x23   :  { %s563_s17 = smov [#allocation8]  }
  0x24   :  { %s59_s18 = sshll.u32 %s563_s17, 4  ;;  %s60_s18 = int_to_ptr.vmem [resolvable:$true] %s59_s18 }
  0x25   :  { %s518_s19 = scalar_lea.vmem %s60_s18, 1024  ;;  %p523_p2 = scmp.lt.s32.totalorder %s60_s18, %s60_s18 }
  0x26   :  { %p519_p1 = scmp.ne.s32.totalorder %s60_s18, %s518_s19  ;;  %p524_p3 = scmp.lt.s32.totalorder %s518_s19, %s518_s19 }
  0x28   :  { %p525_p4 = por %p524_p3, %p523_p2 }
  0x2a   :  { %p526_p5 = pnand %p525_p4, %p519_p1 }
  0x2c   :  { %529 = shalt.err (!%p526_p5)
}
  0x2d   :  { %65 = dma.hbm_to_vmem [thread:$0]  %s673_s5, 1024, %s60_s18, [#allocation9], %s559_s27, %s559_s27, %s560_s28  }
  0x2e   :  { %550 = dma.done.wait [#allocation3], 128  }
  0x2f   :  { %551 = vsyncadd [#allocation3], 4294967168 }
  0x30   :  { %552 = dma.done.wait [#allocation6], 1536  }
  0x31   :  { %553 = vsyncadd [#allocation6], 4294965760 }
  0x32   :  { %554 = dma.done.wait [#allocation9], 1024  }
  0x33   :  { %555 = vsyncadd [#allocation9], 4294966272  ;;  %v564_v0 = vmov 0.0   ;;  %vm565_vm0 = vmmov 0   ;;  %v84_v1 = vld [vmem:[#allocation5 + $0x18] sm:$0xff]  ;;  %v83_v2 = vld [vmem:[#allocation5 + $0x10] sm:$0xff] }
  0x34   :  { %392 = vmatprep.subr.mxu0 %v564_v0  ;;  %400 = vmatprep.mubr.msk.f32.mxu0 %vm565_vm0, %v564_v0  ;;  %v174_v3 = vld [vmem:[#allocation7 + $0x38] sm:$0xff]  ;;  %v82_v4 = vld [vmem:[#allocation5 + $0x8] sm:$0xff]  ;;  %v173_v5 = vld [vmem:[#allocation7 + $0x30] sm:$0xff]  ;;  %vm92_vm1 = vcmask 261120   ;;  %vm182_vm2 = vcmask 523264   ;;  %s566_s24 = smov [#allocation10]  }
  0x35   :  { %403 = vmatprep.subr.mxu1 %v564_v0  ;;  %419 = vmatprep.mubr.msk.f32.mxu1 %vm565_vm0, %v564_v0  ;;  %v172_v6 = vld [vmem:[#allocation7 + $0x28] sm:$0xff]  ;;  %v81_v7 = vld [vmem:[#allocation5] sm:$0xff]  ;;  %v80_v8 = vld [vmem:[#allocation2] sm:$0xff]  ;;  %s352_s25 = sshll.u32 %s566_s24, 4  ;;  %s353_s25 = int_to_ptr.vmem [resolvable:$true] %s352_s25 }
  0x36   :  { %393 = vmatpush3.msra.mxu0 %v84_v1  ;;  %404 = vmatpush3.msra.mxu1 %v174_v3  ;;  %v171_v9 = vld [vmem:[#allocation7 + $0x20] sm:$0xff]  ;;  %v170_v10 = vld [vmem:[#allocation7 + $0x18] sm:$0xff]  ;;  %v169_v11 = vld [vmem:[#allocation7 + $0x10] sm:$0xff]  ;;  %s530_s26 = scalar_lea.vmem %s353_s25, 128  ;;  %p535_p7 = scmp.lt.s32.totalorder %s353_s25, %s353_s25 }
  0x37   :  { %394 = vmatprep.subr.mxu0 %v564_v0  ;;  %405 = vmatprep.subr.mxu1 %v564_v0  ;;  %v168_v12 = vld [vmem:[#allocation7 + $0x8] sm:$0xff]  ;;  %v167_v13 = vld [vmem:[#allocation7] sm:$0xff]  ;;  %v264_v14 = vld [vmem:[#allocation8 + $0x38] sm:$0xff]  ;;  %p531_p6 = scmp.ne.s32.totalorder %s353_s25, %s530_s26  ;;  %p536_p8 = scmp.lt.s32.totalorder %s530_s26, %s530_s26 }
  0x38   :  { %395 = vmatpush3.msra.mxu0 %v83_v2  ;;  %406 = vmatpush3.msra.mxu1 %v173_v5  ;;  %v263_v15 = vld [vmem:[#allocation8 + $0x30] sm:$0xff]  ;;  %v262_v16 = vld [vmem:[#allocation8 + $0x28] sm:$0xff]  ;;  %v261_v17 = vld [vmem:[#allocation8 + $0x20] sm:$0xff] }
  0x39   :  { %396 = vmatprep.subr.mxu0 %v564_v0  ;;  %407 = vmatprep.subr.mxu1 %v564_v0  ;;  %v260_v18 = vld [vmem:[#allocation8 + $0x18] sm:$0xff]  ;;  %v259_v24 = vld [vmem:[#allocation8 + $0x10] sm:$0xff]  ;;  %v258_v25 = vld [vmem:[#allocation8 + $0x8] sm:$0xff]  ;;  %p537_p9 = por %p536_p8, %p535_p7 }
  0x3a   :  { %397 = vmatpush3.msra.mxu0 %v82_v4  ;;  %408 = vmatpush3.msra.mxu1 %v172_v6  ;;  %v363_v19 = vld [vmem:[%s670_s2] ss:$0 sm:$0xff]  ;;  %v257_v26 = vld [vmem:[#allocation8] sm:$0xff] }
  0x3b   :  { %398 = vmatprep.subr.mxu0 %v564_v0  ;;  %409 = vmatprep.subr.mxu1 %v564_v0  ;;  %v365_v27 = vld [vmem:[%s672_s4] ss:$0 sm:$0xff]  ;;  %p538_p10 = pnand %p537_p9, %p531_p6 }
  0x3c   :  { %399 = vmatpush3.msra.mxu0 %v81_v7  ;;  %410 = vmatpush3.msra.mxu1 %v171_v9  ;;  %v367_v32 = vld [vmem:[%s674_s6] ss:$0 sm:$0xff] }
  0x3d   :  { %401 = vmatmul.mubr.msk.f32.vlgmr.msra.gmra.mxu0 %vm92_vm1, %v80_v8  ;;  %411 = vmatprep.subr.mxu1 %v564_v0 }
  0x3e   :  { %422 = vmatprep.subr.mxu0 %v564_v0  ;;  %412 = vmatpush3.msra.mxu1 %v170_v10 }
  0x3f   :  { %438 = vmatprep.mubr.msk.f32.mxu0 %vm565_vm0, %v564_v0  ;;  %413 = vmatprep.subr.mxu1 %v564_v0 }
  0x40   :  { %414 = vmatpush3.msra.mxu1 %v169_v11  ;;  %423 = vmatpush3.msra.mxu0 %v264_v14 }
  0x41   :  { %415 = vmatprep.subr.mxu1 %v564_v0  ;;  %424 = vmatprep.subr.mxu0 %v564_v0 }
  0x42   :  { %416 = vmatpush3.msra.mxu1 %v168_v12  ;;  %425 = vmatpush3.msra.mxu0 %v263_v15 }
  0x43   :  { %417 = vmatprep.subr.mxu1 %v564_v0  ;;  %426 = vmatprep.subr.mxu0 %v564_v0 }
  0x44   :  { %418 = vmatpush3.msra.mxu1 %v167_v13  ;;  %427 = vmatpush3.msra.mxu0 %v262_v16 }
  0x45   :  { %428 = vmatprep.subr.mxu0 %v564_v0 }
  0x46   :  { %429 = vmatpush3.msra.mxu0 %v261_v17 }
  0x47   :  { %430 = vmatprep.subr.mxu0 %v564_v0 }
  0x48   :  { %431 = vmatpush3.msra.mxu0 %v260_v18 }
  0x49   :  { %432 = vmatprep.subr.mxu0 %v564_v0 }
  0x4a   :  { %433 = vmatpush3.msra.mxu0 %v259_v24 }
  0x4b   :  { %434 = vmatprep.subr.mxu0 %v564_v0 }
  0x4c   :  { %435 = vmatpush3.msra.mxu0 %v258_v25 }
  0x4d   :  { %436 = vmatprep.subr.mxu0 %v564_v0 }
  0x4e   :  { %437 = vmatpush3.msra.mxu0 %v257_v26 }
  0xfd   :  { %v162_v20 = vpop.f32.mrf.mxu0 }
  0xfe   :  { %v163_v21 = vadd.f32 %v363_v19, %v162_v20 }
  0xff   :  { %v402_v22 = vpop.f32.mrf.mxu0 }
 0x100   :  { %v166_v23 = vmax.f32 %v163_v21, 0.0 }
 0x102   :  { %420 = vmatmul.mubr.msk.f32.vlgmr.msra.gmra.mxu1 %vm182_vm2, %v166_v23 }
 0x1c2   :  { %v252_v28 = vpop.f32.mrf.mxu1 }
 0x1c3   :  { %v253_v29 = vadd.f32 %v365_v27, %v252_v28 }
 0x1c4   :  { %v421_v30 = vpop.f32.mrf.mxu1 }
 0x1c5   :  { %v256_v31 = vmax.f32 %v253_v29, 0.0 }
 0x1c7   :  { %439 = vmatmul.mubr.msk.f32.vlgmr.msra.gmra.mxu0 %vm182_vm2, %v256_v31 }
 0x287   :  { %v341_v33 = vpop.f32.mrf.mxu0 }
 0x288   :  { %v342_v34 = vadd.f32 %v367_v32, %v341_v33 }
 0x289   :  { %v440_v35 = vpop.f32.mrf.mxu0 }
 0x28a   :  { %345 = vst [vmem:[#allocation10] sm:$0xff] %v342_v34 }
 0x28b   :  { %541 = shalt.err (!%p538_p10)
}
 0x28c   :  { %355 = dma.vmem_to_hbm [thread:$0]  %s353_s25, 128, %s675_s7, [#allocation4]  }
 0x28d   :  { %556 = dma.done.wait [#allocation4], 128  }
 0x28e   :  { %557 = vsyncadd [#allocation4], 4294967168 }
 0x28f   :  { %359 = vsyncpa [#allocation3], 1 }
 0x290   :  { %360 = vsyncpa [#allocation6], 1 }
 0x291   :  { %361 = vsyncpa [#allocation9], 1 }
 0x292   :  { %362 = vsyncpa [#allocation4], 1 }

</bundles_post_ra>
